<compile_context>
chip_gen: v6e
topology: v6e:2x2x1
jax: 0.10.0
libtpu: 0.0.40
codegen_flags: <defaults>
</compile_context>

<pallas_src>
import math
import functools

import jax
import jax.numpy as jnp
from jax.experimental import pallas as pl
from jax.experimental.pallas import tpu as pltpu

HIDDEN = 128   # hardcoded by the PyTorch module
LANE = 128
SUBLANE = 8


def _round_up(x, m):
    return (x + m - 1) // m * m


def _mlp_kernel(x_ref, w1_ref, w2_ref, w3_ref, b_ref, o_ref, *, no_actions):
    # x_ref : (TB, no_states) f32  -- unpadded, cast to bf16 here (no wrapper pad/cast pass)
    # w*_ref: bf16, VMEM-resident  -- w1 (no_states,128), w2 (128,128), w3 (128,128 padded)
    # b_ref : (8,128) f32, rows [b1, b2, b3_padded, 0...]
    # o_ref : (TB, no_actions) f32 -- narrow output block => minimal HBM write stream
    b1 = b_ref[0:1, :]
    b2 = b_ref[1:2, :]
    b3 = b_ref[2:3, :]
    x = x_ref[...].astype(jnp.bfloat16)
    # fc1 + relu (bf16 MXU matmul, f32 accumulate; f32 epilogue is exact on v5e too)
    h = jnp.dot(x, w1_ref[...], preferred_element_type=jnp.float32)
    h = jnp.maximum(h + b1, 0.0)
    # fc2 + relu
    h = jnp.dot(h.astype(jnp.bfloat16), w2_ref[...], preferred_element_type=jnp.float32)
    h = jnp.maximum(h + b2, 0.0)
    # fc3 (no activation); slice the 128-wide MXU result down to the real action columns
    out = jnp.dot(h.astype(jnp.bfloat16), w3_ref[...], preferred_element_type=jnp.float32)
    out = out + b3
    o_ref[...] = out[:, :no_actions].astype(o_ref.dtype)


@functools.partial(jax.jit, static_argnames=("block_b",))
def qconnect_forward(x, params, *, block_b=2048):
    """x: (B, no_states) f32.  params: dict of w1,b1,w2,b2,w3,b3 (weights stored (in,out))."""
    w1, b1, w2, b2, w3, b3 = (params[k] for k in ("w1", "b1", "w2", "b2", "w3", "b3"))
    B, no_states = x.shape
    hidden = w1.shape[1]
    no_actions = w3.shape[1]
    assert hidden == HIDDEN and w2.shape == (hidden, hidden)
    assert no_actions <= LANE  # bias row / output slice assume one lane-width of actions

    # --- batch tiling ---------------------------------------------------------------
    # Fewer, fatter grid steps (per-step overhead ~0.35us), tb always a multiple of 8,
    # tb sized to minimize batch-pad waste, and >=2 steps when possible so the
    # "parallel" axis can shard across both TensorCores on v7x.
    n_steps = pl.cdiv(B, block_b)
    if B >= 2 * SUBLANE:
        n_steps = max(n_steps, 2)
    tb = min(max(block_b, SUBLANE), _round_up(pl.cdiv(B, n_steps), SUBLANE))
    b_pad = _round_up(B, tb)
    grid = (b_pad // tb,)

    # Batch-dim-only pad, and only when tb does not divide B (Python-level branch, so the
    # common aligned case touches x in HBM exactly once, inside the kernel).
    xp = x if b_pad == B else jnp.pad(x, ((0, b_pad - B), (0, 0)))

    # --- weights / biases (tiny, one-time casts; VMEM-resident in the kernel) --------
    w1p = w1.astype(jnp.bfloat16)                              # (no_states, 128), K unpadded
    w2p = w2.astype(jnp.bfloat16)                              # (128, 128)
    n_pad = LANE                                               # fc3 runs MXU full width
    w3p = jnp.zeros((hidden, n_pad), jnp.bfloat16).at[:, :no_actions].set(
        w3.astype(jnp.bfloat16))
    # Fold all three biases into one (8,128) f32 tile: rows 0,1,2 = b1, b2, b3 (padded).
    bias = jnp.zeros((SUBLANE, LANE), jnp.float32)
    bias = bias.at[0, :hidden].set(b1.reshape(-1))
    bias = bias.at[1, :hidden].set(b2.reshape(-1))
    bias = bias.at[2, :no_actions].set(b3.reshape(-1))

    flops = 2 * b_pad * (no_states * hidden + hidden * hidden + hidden * n_pad)
    bytes_accessed = (xp.size * 4 + w1p.size * 2 + w2p.size * 2 + w3p.size * 2
                      + bias.size * 4 + b_pad * no_actions * 4)

    # TODO(synk): for tb >= 2048 an inner fori_loop over 512-row sub-tiles would let early
    # output sub-tiles start their writeback DMA sooner; kernel is HBM-bound so skipped.
    out = pl.pallas_call(
        functools.partial(_mlp_kernel, no_actions=no_actions),
        out_shape=jax.ShapeDtypeStruct((b_pad, no_actions), jnp.float32),
        grid=grid,
        in_specs=[
            pl.BlockSpec((tb, no_states), lambda i: (i, 0)),       # x: f32, unpadded K, tiled
            pl.BlockSpec((no_states, hidden), lambda i: (0, 0)),   # w1: VMEM-resident
            pl.BlockSpec((hidden, hidden), lambda i: (0, 0)),      # w2: VMEM-resident
            pl.BlockSpec((hidden, n_pad), lambda i: (0, 0)),       # w3: VMEM-resident
            pl.BlockSpec((SUBLANE, LANE), lambda i: (0, 0)),       # fused biases
        ],
        out_specs=pl.BlockSpec((tb, no_actions), lambda i: (i, 0)),  # narrow f32 output
        compiler_params=pltpu.CompilerParams(
            dimension_semantics=("parallel",)),
        cost_estimate=pl.CostEstimate(
            flops=flops, transcendentals=0, bytes_accessed=bytes_accessed),
    )(xp, w1p, w2p, w3p, bias)
    return out if b_pad == B else out[:B]


def init_params(key, no_states, no_actions, hidden=HIDDEN):
    """Deterministic init mimicking torch.nn.Linear default (U(-1/sqrt(fan_in), +1/sqrt(fan_in)))."""
    ks = jax.random.split(key, 6)

    def linear(kw, kb, fan_in, fan_out):
        bound = 1.0 / math.sqrt(fan_in)
        w = jax.random.uniform(kw, (fan_in, fan_out), jnp.float32, -bound, bound)
        b = jax.random.uniform(kb, (1, fan_out), jnp.float32, -bound, bound)
        return w, b

    w1, b1 = linear(ks[0], ks[1], no_states, hidden)
    w2, b2 = linear(ks[2], ks[3], hidden, hidden)
    w3, b3 = linear(ks[4], ks[5], hidden, no_actions)
    return {"w1": w1, "b1": b1, "w2": w2, "b2": b2, "w3": w3, "b3": b3}


if __name__ == "__main__":
    # Connect-4-ish sizes: board 6x7 = 42 states, 7 actions (columns), small batch.
    # TODO(synk): sample_action's epsilon-greedy / legal-move masking is host-side RL
    # control flow and is intentionally left outside the kernel.
    no_states, no_actions, batch = 42, 7, 2
    key = jax.random.PRNGKey(0)
    kx, kp = jax.random.split(key)
    x = jax.random.normal(kx, (batch, no_states), jnp.float32)
    params = init_params(kp, no_states, no_actions)

    out = qconnect_forward(x, params)
    out = jax.block_until_ready(out)

    # Pure-JAX f32 reference of the same forward pass (kernel uses bf16 weights/activations
    # with f32 accumulation, hence the loosened tolerance).
    h = jnp.maximum(x @ params["w1"] + params["b1"], 0.0)
    h = jnp.maximum(h @ params["w2"] + params["b2"], 0.0)
    ref = h @ params["w3"] + params["b3"]
    assert out.shape == (batch, no_actions)
    assert jnp.allclose(out, ref, atol=5e-2, rtol=5e-2), float(jnp.max(jnp.abs(out - ref)))

    print("KERNEL_OK")
</pallas_src>

<mosaic_0001>
module attributes {stable_mosaic.version = 11 : i64} {
  func.func @_mlp_kernel(%arg0: i32, %arg1: memref<8x42xf32, #tpu.memory_space<vmem>>, %arg2: memref<42x128xbf16, #tpu.memory_space<vmem>>, %arg3: memref<128x128xbf16, #tpu.memory_space<vmem>>, %arg4: memref<128x128xbf16, #tpu.memory_space<vmem>>, %arg5: memref<8x128xf32, #tpu.memory_space<vmem>>, %arg6: memref<8x7xf32, #tpu.memory_space<vmem>>) attributes {dimension_semantics = [#tpu.dimension_semantics<parallel>], iteration_bounds = array<i64: 1>, scalar_prefetch = 0 : i64, scratch_operands = 0 : i64, tpu.core_type = #tpu.core_type<tc>, window_params = [{transform_indices = @transform_0, window_bounds = array<i64: 8, 42>}, {pipeline_mode = #tpu.pipeline_mode<synchronous>, transform_indices = @transform_1, window_bounds = array<i64: 42, 128>}, {pipeline_mode = #tpu.pipeline_mode<synchronous>, transform_indices = @transform_2, window_bounds = array<i64: 128, 128>}, {pipeline_mode = #tpu.pipeline_mode<synchronous>, transform_indices = @transform_3, window_bounds = array<i64: 128, 128>}, {pipeline_mode = #tpu.pipeline_mode<synchronous>, transform_indices = @transform_4, window_bounds = array<i64: 8, 128>}, {transform_indices = @transform_5, window_bounds = array<i64: 8, 7>}]} {
    %c0 = arith.constant 0 : index
    %c0_0 = arith.constant 0 : index
    %0 = vector.load %arg5[%c0, %c0_0] : memref<8x128xf32, #tpu.memory_space<vmem>>, vector<1x128xf32>
    %c1 = arith.constant 1 : index
    %c0_1 = arith.constant 0 : index
    %1 = vector.load %arg5[%c1, %c0_1] : memref<8x128xf32, #tpu.memory_space<vmem>>, vector<1x128xf32>
    %c2 = arith.constant 2 : index
    %c0_2 = arith.constant 0 : index
    %2 = vector.load %arg5[%c2, %c0_2] : memref<8x128xf32, #tpu.memory_space<vmem>>, vector<1x128xf32>
    %c0_3 = arith.constant 0 : index
    %c0_4 = arith.constant 0 : index
    %3 = vector.load %arg1[%c0_3, %c0_4] : memref<8x42xf32, #tpu.memory_space<vmem>>, vector<8x42xf32>
    %4 = arith.truncf %3 : vector<8x42xf32> to vector<8x42xbf16>
    %c0_5 = arith.constant 0 : index
    %c0_6 = arith.constant 0 : index
    %5 = vector.load %arg2[%c0_5, %c0_6] : memref<42x128xbf16, #tpu.memory_space<vmem>>, vector<42x128xbf16>
    %cst = arith.constant dense<0.000000e+00> : vector<8x128xf32>
    %6 = tpu.matmul %4, %5, %cst {dimension_numbers = #tpu.dot_dimension_numbers<[1], [0], [0], [1], [0, 0, 1, 1], [], []>} : vector<8x42xbf16>, vector<42x128xbf16>, vector<8x128xf32> -> vector<8x128xf32>
    %7 = vector.broadcast %0 : vector<1x128xf32> to vector<8x128xf32>
    %8 = arith.addf %6, %7 : vector<8x128xf32>
    %cst_7 = arith.constant 0.000000e+00 : f32
    %9 = vector.broadcast %cst_7 : f32 to vector<8x128xf32>
    %10 = arith.maximumf %8, %9 : vector<8x128xf32>
    %11 = arith.truncf %10 : vector<8x128xf32> to vector<8x128xbf16>
    %c0_8 = arith.constant 0 : index
    %c0_9 = arith.constant 0 : index
    %12 = vector.load %arg3[%c0_8, %c0_9] : memref<128x128xbf16, #tpu.memory_space<vmem>>, vector<128x128xbf16>
    %cst_10 = arith.constant dense<0.000000e+00> : vector<8x128xf32>
    %13 = tpu.matmul %11, %12, %cst_10 {dimension_numbers = #tpu.dot_dimension_numbers<[1], [0], [0], [1], [0, 0, 1, 1], [], []>} : vector<8x128xbf16>, vector<128x128xbf16>, vector<8x128xf32> -> vector<8x128xf32>
    %14 = vector.broadcast %1 : vector<1x128xf32> to vector<8x128xf32>
    %15 = arith.addf %13, %14 : vector<8x128xf32>
    %cst_11 = arith.constant 0.000000e+00 : f32
    %16 = vector.broadcast %cst_11 : f32 to vector<8x128xf32>
    %17 = arith.maximumf %15, %16 : vector<8x128xf32>
    %18 = arith.truncf %17 : vector<8x128xf32> to vector<8x128xbf16>
    %c0_12 = arith.constant 0 : index
    %c0_13 = arith.constant 0 : index
    %19 = vector.load %arg4[%c0_12, %c0_13] : memref<128x128xbf16, #tpu.memory_space<vmem>>, vector<128x128xbf16>
    %cst_14 = arith.constant dense<0.000000e+00> : vector<8x128xf32>
    %20 = tpu.matmul %18, %19, %cst_14 {dimension_numbers = #tpu.dot_dimension_numbers<[1], [0], [0], [1], [0, 0, 1, 1], [], []>} : vector<8x128xbf16>, vector<128x128xbf16>, vector<8x128xf32> -> vector<8x128xf32>
    %21 = vector.broadcast %2 : vector<1x128xf32> to vector<8x128xf32>
    %22 = arith.addf %20, %21 : vector<8x128xf32>
    %23 = vector.extract_strided_slice %22 {offsets = [0, 0], sizes = [8, 7], strides = [1, 1]} : vector<8x128xf32> to vector<8x7xf32>
    %c0_15 = arith.constant 0 : index
    %c0_16 = arith.constant 0 : index
    %24 = vector.load %arg6[%c0_15, %c0_16] : memref<8x7xf32, #tpu.memory_space<vmem>>, vector<8x7xf32>
    tpu.vector_store %arg6[%c0_15, %c0_16], %23 {strides = array<i32>} : memref<8x7xf32, #tpu.memory_space<vmem>>, vector<8x7xf32>,
    return
  }
  func.func @transform_0(%arg0: i32) -> (i32, i32) {
    %c0_i32 = arith.constant 0 : i32
    %c0_i32_0 = arith.constant 0 : i32
    return %arg0, %c0_i32 : i32, i32
  }
  func.func @transform_1(%arg0: i32) -> (i32, i32) {
    %c0_i32 = arith.constant 0 : i32
    %c0_i32_0 = arith.constant 0 : i32
    %c0_i32_1 = arith.constant 0 : i32
    return %c0_i32, %c0_i32_0 : i32, i32
  }
  func.func @transform_2(%arg0: i32) -> (i32, i32) {
    %c0_i32 = arith.constant 0 : i32
    %c0_i32_0 = arith.constant 0 : i32
    %c0_i32_1 = arith.constant 0 : i32
    return %c0_i32, %c0_i32_0 : i32, i32
  }
  func.func @transform_3(%arg0: i32) -> (i32, i32) {
    %c0_i32 = arith.constant 0 : i32
    %c0_i32_0 = arith.constant 0 : i32
    %c0_i32_1 = arith.constant 0 : i32
    return %c0_i32, %c0_i32_0 : i32, i32
  }
  func.func @transform_4(%arg0: i32) -> (i32, i32) {
    %c0_i32 = arith.constant 0 : i32
    %c0_i32_0 = arith.constant 0 : i32
    %c0_i32_1 = arith.constant 0 : i32
    return %c0_i32, %c0_i32_0 : i32, i32
  }
  func.func @transform_5(%arg0: i32) -> (i32, i32) {
    %c0_i32 = arith.constant 0 : i32
    %c0_i32_0 = arith.constant 0 : i32
    return %arg0, %c0_i32 : i32, i32
  }
}

</mosaic_0001>

<bundles_post_ra>
// kernel: qconnect_forward.1
= control target key start
LH: loop header
LB: loop body
LE: loop exit
PB: predicated region body
PF: predicated region fallthrough
CT: control target
= control target key end

     0   :  { %vm57_vm0 = vcmask 1044480   ;;  %v443_v0 = vmov 0.0   ;;  %vm444_vm1 = vmmov 0   ;;  %vm53_vm2 = vcmask 343040   ;;  %s572_s1 = inlined_call_operand.vmem [shape: bf16[42,128], index: 1, kind: input, shape index: {}]   ;;  %s573_s2 = inlined_call_operand.vmem [shape: bf16[128,128], index: 2, kind: input, shape index: {}]   ;;  %s574_s0 = inlined_call_operand.vmem [shape: f32[8,42], index: 0, kind: input, shape index: {}]   ;;  %s575_s3 = inlined_call_operand.vmem [shape: bf16[128,128], index: 3, kind: input, shape index: {}]   ;;  %s576_s4 = inlined_call_operand.vmem [shape: f32[8,128], index: 4, kind: input, shape index: {}]   ;;  %s577_s5 = inlined_call_operand.vmem [shape: f32[8,7], index: 5, kind: output, shape index: {}]  }
   0x1   :  { %372 = vmatprep.subr.bf16.mxu0 %v443_v0  ;;  %v424_v1 = vld [vmem:[%s572_s1 + $0x10] sm:$0x1f]   ;;  %378 = vmatprep.mubr.msk.bf16.mxu0 %vm444_vm1, %v443_v0  ;;  %v425_v3 = vld [vmem:[%s572_s1 + $0x8] sm:$0xff]   ;;  %v427_v4 = vld [vmem:[%s573_s2 + $0x38] sm:$0xff]   ;;  %vm321_vm3 = vcmask 56320  }
   0x2   :  { %382 = vmatprep.subr.bf16.mxu1 %v443_v0  ;;  %398 = vmatprep.mubr.msk.bf16.mxu1 %vm444_vm1, %v443_v0  ;;  %v59_v2 = vsel %vm57_vm0, %v424_v1, 0  ;;  %v426_v5 = vld [vmem:[%s572_s1] sm:$0xff]   ;;  %v428_v6 = vld [vmem:[%s573_s2 + $0x30] sm:$0xff]   ;;  %v429_v8 = vld [vmem:[%s573_s2 + $0x28] sm:$0xff]  }
   0x3   :  { %373 = vmatpush3.bf16.msra.mxu0 %v59_v2  ;;  %383 = vmatpush3.bf16.msra.mxu1 %v427_v4  ;;  %v24_v7 = vld [vmem:[%s574_s0] sm:$0xff]  ;;  %v431_v11 = vld [vmem:[%s573_s2 + $0x18] sm:$0xff]   ;;  %v432_v12 = vld [vmem:[%s573_s2 + $0x10] sm:$0xff]  }
   0x4   :  { %374 = vmatprep.subr.bf16.mxu0 %v443_v0  ;;  %384 = vmatprep.subr.bf16.mxu1 %v443_v0  ;;  %v25_v9 = vpack.c.bf16 %v24_v7, %v24_v7  ;;  %v430_v10 = vld [vmem:[%s573_s2 + $0x20] sm:$0xff]   ;;  %v433_v13 = vld [vmem:[%s573_s2 + $0x8] sm:$0xff]   ;;  %v435_v15 = vld [vmem:[%s575_s3 + $0x38] sm:$0xff]  }
   0x5   :  { %v434_v14 = vld [vmem:[%s573_s2] sm:$0xff]   ;;  %v436_v16 = vld [vmem:[%s575_s3 + $0x30] sm:$0xff]   ;;  %v437_v17 = vld [vmem:[%s575_s3 + $0x28] sm:$0xff]  }
   0x6   :  { %v438_v18 = vld [vmem:[%s575_s3 + $0x20] sm:$0xff]   ;;  %v439_v19 = vld [vmem:[%s575_s3 + $0x18] sm:$0xff]   ;;  %v440_v20 = vld [vmem:[%s575_s3 + $0x10] sm:$0xff]  }
   0x7   :  { %375 = vmatpush3.bf16.msra.mxu0 %v425_v3  ;;  %385 = vmatpush3.bf16.msra.mxu1 %v428_v6  ;;  %v327_v21 = vld [vmem:[%s576_s4] ss:$0 sm:$0xff]  ;;  %v441_v29 = vld [vmem:[%s575_s3 + $0x8] sm:$0xff]   ;;  %v332_v31 = vld [vmem:[%s576_s4 + $0x1] ss:$0 sm:$0xff] }
   0x8   :  { %376 = vmatprep.subr.bf16.mxu0 %v443_v0  ;;  %386 = vmatprep.subr.bf16.mxu1 %v443_v0  ;;  %v442_v30 = vld [vmem:[%s575_s3] sm:$0xff]  }
   0x9   :  { %v341_v39 = vld [vmem:[%s576_s4 + $0x2] ss:$0 sm:$0xff] }
   0xb   :  { %377 = vmatpush3.bf16.msra.mxu0 %v426_v5  ;;  %387 = vmatpush3.bf16.msra.mxu1 %v429_v8 }
   0xc   :  { %402 = vmatprep.subr.bf16.mxu0 %v443_v0  ;;  %388 = vmatprep.subr.bf16.mxu1 %v443_v0 }
   0xe   :  { %379 = vmatmul.mubr.msk.bf16.vlgmr.msra.gmra.mxu0 %vm53_vm2, %v25_v9 }
   0xf   :  { %418 = vmatprep.mubr.msk.bf16.mxu0 %vm444_vm1, %v443_v0  ;;  %389 = vmatpush3.bf16.msra.mxu1 %v430_v10 }
  0x10   :  { %390 = vmatprep.subr.bf16.mxu1 %v443_v0  ;;  %403 = vmatpush3.bf16.msra.mxu0 %v435_v15 }
  0x11   :  { %404 = vmatprep.subr.bf16.mxu0 %v443_v0 }
  0x13   :  { %391 = vmatpush3.bf16.msra.mxu1 %v431_v11 }
  0x14   :  { %392 = vmatprep.subr.bf16.mxu1 %v443_v0  ;;  %405 = vmatpush3.bf16.msra.mxu0 %v436_v16 }
  0x15   :  { %406 = vmatprep.subr.bf16.mxu0 %v443_v0 }
  0x17   :  { %393 = vmatpush3.bf16.msra.mxu1 %v432_v12 }
  0x18   :  { %394 = vmatprep.subr.bf16.mxu1 %v443_v0  ;;  %407 = vmatpush3.bf16.msra.mxu0 %v437_v17 }
  0x19   :  { %408 = vmatprep.subr.bf16.mxu0 %v443_v0 }
  0x1b   :  { %395 = vmatpush3.bf16.msra.mxu1 %v433_v13 }
  0x1c   :  { %396 = vmatprep.subr.bf16.mxu1 %v443_v0  ;;  %409 = vmatpush3.bf16.msra.mxu0 %v438_v18 }
  0x1d   :  { %410 = vmatprep.subr.bf16.mxu0 %v443_v0 }
  0x1f   :  { %397 = vmatpush3.bf16.msra.mxu1 %v434_v14 }
  0x20   :  { %411 = vmatpush3.bf16.msra.mxu0 %v439_v19 }
  0x21   :  { %412 = vmatprep.subr.bf16.mxu0 %v443_v0 }
  0x24   :  { %413 = vmatpush3.bf16.msra.mxu0 %v440_v20 }
  0x25   :  { %414 = vmatprep.subr.bf16.mxu0 %v443_v0 }
  0x28   :  { %415 = vmatpush3.bf16.msra.mxu0 %v441_v29 }
  0x29   :  { %416 = vmatprep.subr.bf16.mxu0 %v443_v0 }
  0x2c   :  { %417 = vmatpush3.bf16.msra.mxu0 %v442_v30 }
  0xce   :  { %v95_v22 = vpop.f32.mrf.mxu0 }
  0xcf   :  { %v96_v23 = vadd.f32 %v327_v21, %v95_v22 }
  0xd0   :  { %v380_v24 = vpop.f32.mrf.mxu0 }
  0xd1   :  { %v101_v25 = vmax.f32 %v96_v23, 0.0 }
  0xd2   :  { %v98_v26 = vpop.f32.mrf.mxu0 }
  0xd3   :  { %v102_v27 = vpack.c.bf16 %v101_v25, %v101_v25 }
  0xd4   :  { %v381_v28 = vpop.f32.mrf.mxu0 }
  0xd5   :  { %399 = vmatmul.mubr.bf16.vlgmr.msra.gmra.mxu1 %v102_v27 }
 0x195   :  { %v205_v32 = vpop.f32.mrf.mxu1 }
 0x196   :  { %v206_v33 = vadd.f32 %v332_v31, %v205_v32 }
 0x197   :  { %v400_v34 = vpop.f32.mrf.mxu1 }
 0x198   :  { %v211_v35 = vmax.f32 %v206_v33, 0.0 }
 0x199   :  { %v208_v36 = vpop.f32.mrf.mxu1 }
 0x19a   :  { %v212_v37 = vpack.c.bf16 %v211_v35, %v211_v35 }
 0x19b   :  { %v401_v38 = vpop.f32.mrf.mxu1 }
 0x19c   :  { %419 = vmatmul.mubr.bf16.vlgmr.msra.gmra.mxu0 %v212_v37 }
 0x25c   :  { %v315_v40 = vpop.f32.mrf.mxu0 }
 0x25d   :  { %v316_v41 = vadd.f32 %v341_v39, %v315_v40 }
 0x25e   :  { %v420_v42 = vpop.f32.mrf.mxu0 }
 0x25f   :  { %322 = vst.msk [vmem:[%s577_s5] sm:$0xff] %vm321_vm3, %v316_v41 }
 0x260   :  { %v318_v43 = vpop.f32.mrf.mxu0 }
 0x262   :  { %v421_v44 = vpop.f32.mrf.mxu0 }

</bundles_post_ra>
